<compile_context>
chip_gen: v7x
topology: tpu7x:2x2x1
jax: 0.10.0
libtpu: 0.0.40
codegen_flags: <defaults>
</compile_context>

<pallas_src>
import jax
import jax.numpy as jnp
from jax import lax
from jax.experimental import pallas as pl
from jax.experimental.pallas import tpu as pltpu


def _deberta_head_kernel(qcat_ref, kcat_ref, v_ref, attn_ref, out_ref,
                         sum_ref, acc_ref):
    f32 = jnp.float32
    q_idx = pl.program_id(1)
    tq = attn_ref.shape[1]          # query-tile rows (== kv chunk width)
    Tp = attn_ref.shape[2]          # padded sequence length
    nk = Tp // tq                   # number of kv chunks (static)

    # Single fused score matmul: [cq+pq | cq] @ [ck^T ; pk^T] -> (tq, Tp), f32 acc.
    wei = jnp.dot(qcat_ref[0], kcat_ref[0], preferred_element_type=f32)

    # Causal mask (replaces the module's tril buffer); it also masks the
    # padded key columns for every real query row.
    q0 = q_idx * tq
    rows = q0 + lax.broadcasted_iota(jnp.int32, (tq, Tp), 0)
    cols = lax.broadcasted_iota(jnp.int32, (tq, Tp), 1)
    wei = jnp.where(rows >= cols, wei, -jnp.inf)

    # Row max over live entries (diagonal is always live -> finite).
    m = jnp.max(wei, axis=-1, keepdims=True)

    sum_ref[...] = jnp.zeros_like(sum_ref)
    acc_ref[...] = jnp.zeros_like(acc_ref)

    v_dt = v_ref.dtype
    # Causal block-sparsity: only kv chunks j <= q_idx contribute; the rest of
    # the attention row is exactly zero (store zeros, skip exp / attn@V).
    for j in range(nk):
        lo, hi = j * tq, (j + 1) * tq

        @pl.when(j <= q_idx)
        def _live():
            e = jnp.exp(wei[:, lo:hi] - m)                        # (tq, tq) f32
            attn_ref[0, :, lo:hi] = e.astype(attn_ref.dtype)      # unnormalized
            sum_ref[...] += jnp.sum(e, axis=-1, keepdims=True)
            acc_ref[...] += jnp.dot(e.astype(v_dt), v_ref[0, lo:hi, :],
                                    preferred_element_type=f32)

        @pl.when(j > q_idx)
        def _dead():
            attn_ref[0, :, lo:hi] = jnp.zeros((tq, hi - lo), attn_ref.dtype)

    # Softmax denominator: EUP reciprocal + one Newton step (f32-level accuracy).
    # Safe: every causal row contains its diagonal, so s >= 1.
    s = sum_ref[...]
    inv = pl.reciprocal(s, approx=True)
    inv = inv * (2.0 - s * inv)
    attn_ref[0] = (attn_ref[0].astype(f32) * inv).astype(attn_ref.dtype)
    out_ref[0] = (acc_ref[...] * inv).astype(out_ref.dtype)


def deberta_head(x, positional_encoding, params, head_size, *,
                 block_q=None,
                 compute_dtype=jnp.float32,     # dtype of the score matmul operands
                 value_dtype=jnp.bfloat16,      # dtype of V and the attn@V matmul
                 attn_dtype=jnp.float32):       # dtype of the (B,T,T) attention output
    """x: (B, T, n_embd). Returns (attention_M (B,T,T), results (B,T,head_size) f32)."""
    B, T, C = x.shape
    H = head_size
    f32 = jnp.float32

    # ---- hardware-aware budgets (never request the full physical VMEM) ----
    try:
        vmem_cap = int(pltpu.get_tpu_info().vmem_capacity_bytes)
    except Exception:
        vmem_cap = 64 * 1024 * 1024
    vmem_limit = min(vmem_cap * 3 // 4, 96 * 1024 * 1024)
    if block_q is None:
        block_q = 128 if vmem_cap <= 64 * 1024 * 1024 else 256

    # Query tiling; pad T up to a multiple of the tile (tail rows are masked by
    # the causal mask and sliced away below) instead of falling back to tq=T.
    tq = block_q if T > block_q else T
    Tp = -(-T // tq) * tq
    nq = Tp // tq

    Hp = -(-H // 128) * 128                     # lane-dense results pad

    # ---- one-time projections / fused operand construction (plain XLA) ----
    scale = (3.0 * H) ** (-0.5)
    wck = params["content_key"].T.astype(f32)       # (C, H)
    wcq = params["content_query"].T.astype(f32)
    wpk = params["position_key"].T.astype(f32)
    wpq = params["position_query"].T.astype(f32)
    wv = params["value"].T.astype(f32) * scale      # scale folded in once

    xp = x.astype(f32)
    pos = positional_encoding.astype(f32)
    if Tp != T:
        xp = jnp.pad(xp, ((0, 0), (0, Tp - T), (0, 0)))
        pos = jnp.pad(pos, ((0, Tp - T), (0, 0)))

    cq = xp @ wcq                                   # (B, Tp, H)
    ck = xp @ wck                                   # (B, Tp, H)
    pq = pos @ wpq                                  # (Tp, H)
    pk = pos @ wpk                                  # (Tp, H)
    v = xp @ wv                                     # (B, Tp, H)
    if Hp != H:
        v = jnp.pad(v, ((0, 0), (0, 0), (0, Hp - H)))

    # Fused-score operands:  wei = [cq+pq | cq] @ [ck^T ; pk^T]
    qcat = jnp.concatenate([cq + pq[None], cq], axis=-1).astype(compute_dtype)   # (B,Tp,2H)
    kcat = jnp.concatenate(
        [jnp.swapaxes(ck, -1, -2),
         jnp.broadcast_to(pk.T[None], (B, H, Tp))], axis=1).astype(compute_dtype)  # (B,2H,Tp)
    v = v.astype(value_dtype)                                                      # (B,Tp,Hp)

    H2 = 2 * H

    grid_spec = pltpu.PrefetchScalarGridSpec(
        num_scalar_prefetch=0,
        grid=(B, nq),
        in_specs=[
            pl.BlockSpec((1, tq, H2), lambda b, q: (b, q, 0)),   # fused query operand
            pl.BlockSpec((1, H2, Tp), lambda b, q: (b, 0, 0)),   # fused key operand (per batch)
            pl.BlockSpec((1, Tp, Hp), lambda b, q: (b, 0, 0)),   # V (per batch)
        ],
        out_specs=[
            pl.BlockSpec((1, tq, Tp), lambda b, q: (b, q, 0)),   # attention_M tile
            pl.BlockSpec((1, tq, Hp), lambda b, q: (b, q, 0)),   # results tile (padded)
        ],
        scratch_shapes=[
            pltpu.VMEM((tq, 1), f32),       # softmax row sums
            pltpu.VMEM((tq, Hp), f32),      # attn@V accumulator
        ],
    )

    attn_p, res_p = pl.pallas_call(
        _deberta_head_kernel,
        out_shape=(
            jax.ShapeDtypeStruct((B, Tp, Tp), attn_dtype),
            jax.ShapeDtypeStruct((B, Tp, Hp), f32),
        ),
        grid_spec=grid_spec,
        compiler_params=pltpu.CompilerParams(
            dimension_semantics=("parallel", "parallel"),
            vmem_limit_bytes=vmem_limit,
        ),
    )(qcat, kcat, v)

    attn = attn_p[:, :T, :T]
    results = res_p[:, :T, :H]
    return attn, results


def _reference(x, pos, params, head_size):
    # Pure-f32 JAX reference mirroring the PyTorch forward (eval-mode dropout).
    T = x.shape[1]
    ck = x @ params["content_key"].T
    cq = x @ params["content_query"].T
    pk = pos @ params["position_key"].T
    pq = pos @ params["position_query"].T
    v = (x @ params["value"].T) * (3 * head_size) ** (-0.5)
    wei = cq @ jnp.swapaxes(ck, -1, -2) + pq @ jnp.swapaxes(ck, -1, -2) + cq @ pk.T
    tril = jnp.tril(jnp.ones((T, T), dtype=jnp.float32))
    wei = jnp.where(tril == 0.0, -jnp.inf, wei)
    attn = jax.nn.softmax(wei, axis=-1)
    return attn, attn @ v


def _make_inputs(key, B, T, C, H):
    k_x, k_pos, k1, k2, k3, k4, k5 = jax.random.split(key, 7)
    x = jax.random.normal(k_x, (B, T, C), dtype=jnp.float32)
    pos = jax.random.normal(k_pos, (T, C), dtype=jnp.float32)
    init = lambda k: jax.random.normal(k, (H, C), dtype=jnp.float32) * (C ** -0.5)
    params = {
        "content_key": init(k1),
        "content_query": init(k2),
        "position_key": init(k3),
        "position_query": init(k4),
        "value": init(k5),
    }
    return x, pos, params


if __name__ == "__main__":
    # Shapes consistent with the module: B=2, T=block_size=8, n_embd=32, head_size=16.
    B, T, C, H = 2, 8, 32, 16
    x, pos, params = _make_inputs(jax.random.PRNGKey(0), B, T, C, H)
    attn_ref, res_ref = _reference(x, pos, params, H)

    # 1) Exact-fidelity path (f32 scores + f32 values).
    attn32, res32 = deberta_head(x, pos, params, H, value_dtype=jnp.float32)
    jax.block_until_ready((attn32, res32))
    assert attn32.shape == (B, T, T) and res32.shape == (B, T, H)
    assert jnp.allclose(attn32, attn_ref, atol=1e-3, rtol=1e-3)
    assert jnp.allclose(res32, res_ref, atol=1e-3, rtol=1e-3)

    # 2) Default fast path (f32 scores, bf16 attn@V): loose sanity bound.
    attn_d, res_d = deberta_head(x, pos, params, H)
    jax.block_until_ready((attn_d, res_d))
    assert attn_d.shape == (B, T, T) and res_d.shape == (B, T, H)
    assert jnp.allclose(attn_d, attn_ref, atol=1e-3, rtol=1e-3)   # scores are f32
    assert jnp.allclose(res_d, res_ref, atol=1e-1, rtol=1e-1)

    # 3) Multi-tile + ragged-T path: exercises causal chunk skipping and the
    #    pad-T-to-a-multiple-of-block_q fallback (T=13 padded to 16, tq=8).
    T2 = 13
    x2, pos2, params2 = _make_inputs(jax.random.PRNGKey(0), B, T2, C, H)
    a_ref2, r_ref2 = _reference(x2, pos2, params2, H)
    a2, r2 = deberta_head(x2, pos2, params2, H, block_q=8, value_dtype=jnp.float32)
    jax.block_until_ready((a2, r2))
    assert a2.shape == (B, T2, T2) and r2.shape == (B, T2, H)
    assert jnp.allclose(a2, a_ref2, atol=1e-3, rtol=1e-3)
    assert jnp.allclose(r2, r_ref2, atol=1e-3, rtol=1e-3)

    print("KERNEL_OK")
</pallas_src>

<mosaic_0001>
module attributes {stable_mosaic.version = 11 : i64} {
  func.func @_deberta_head_kernel(%arg0: i32, %arg1: i32, %arg2: memref<1x8x32xf32, #tpu.memory_space<vmem>>, %arg3: memref<1x32x8xf32, #tpu.memory_space<vmem>>, %arg4: memref<1x8x128xf32, #tpu.memory_space<vmem>>, %arg5: memref<1x8x8xf32, #tpu.memory_space<vmem>>, %arg6: memref<1x8x128xf32, #tpu.memory_space<vmem>>, %arg7: memref<8x1xf32, #tpu.memory_space<vmem>>, %arg8: memref<8x128xf32, #tpu.memory_space<vmem>>) attributes {dimension_semantics = [#tpu.dimension_semantics<parallel>, #tpu.dimension_semantics<parallel>], iteration_bounds = array<i64: 2, 1>, scalar_prefetch = 0 : i64, scratch_operands = 2 : i64, tpu.core_type = #tpu.core_type<tc>, window_params = [{transform_indices = @transform_0, window_bounds = array<i64: 1, 8, 32>}, {transform_indices = @transform_1, window_bounds = array<i64: 1, 32, 8>}, {transform_indices = @transform_2, window_bounds = array<i64: 1, 8, 128>}, {transform_indices = @transform_3, window_bounds = array<i64: 1, 8, 8>}, {transform_indices = @transform_4, window_bounds = array<i64: 1, 8, 128>}]} {
    %c0 = arith.constant 0 : index
    %c0_0 = arith.constant 0 : index
    %c0_1 = arith.constant 0 : index
    %0 = vector.load %arg2[%c0, %c0_0, %c0_1] : memref<1x8x32xf32, #tpu.memory_space<vmem>>, vector<1x8x32xf32>
    %1 = vector.shape_cast %0 : vector<1x8x32xf32> to vector<8x32xf32>
    %c0_2 = arith.constant 0 : index
    %c0_3 = arith.constant 0 : index
    %c0_4 = arith.constant 0 : index
    %2 = vector.load %arg3[%c0_2, %c0_3, %c0_4] : memref<1x32x8xf32, #tpu.memory_space<vmem>>, vector<1x32x8xf32>
    %3 = vector.shape_cast %2 : vector<1x32x8xf32> to vector<32x8xf32>
    %cst = arith.constant dense<0.000000e+00> : vector<8x8xf32>
    %4 = tpu.matmul %1, %3, %cst {dimension_numbers = #tpu.dot_dimension_numbers<[1], [0], [0], [1], [0, 0, 1, 1], [], []>} : vector<8x32xf32>, vector<32x8xf32>, vector<8x8xf32> -> vector<8x8xf32>
    %c8_i32 = arith.constant 8 : i32
    %5 = arith.muli %arg1, %c8_i32 : i32
    %6 = tpu.iota {dimensions = array<i32: 0>} : vector<8x8xi32>
    %7 = vector.broadcast %5 : i32 to vector<8x8xi32>
    %8 = arith.addi %7, %6 : vector<8x8xi32>
    %9 = tpu.iota {dimensions = array<i32: 1>} : vector<8x8xi32>
    %10 = arith.cmpi sge, %8, %9 : vector<8x8xi32>
    %cst_5 = arith.constant 0xFF800000 : f32
    %11 = vector.broadcast %cst_5 : f32 to vector<8x8xf32>
    %12 = arith.select %10, %4, %11 : vector<8x8xi1>, vector<8x8xf32>
    %cst_6 = arith.constant dense<0xFF800000> : vector<8xf32>
    %13 = vector.multi_reduction <maximumf>, %12, %cst_6 [1] : vector<8x8xf32> to vector<8xf32>
    %14 = vector.shape_cast %13 : vector<8xf32> to vector<8x1xf32>
    %cst_7 = arith.constant 0.000000e+00 : f32
    %15 = vector.broadcast %cst_7 : f32 to vector<8x1xf32>
    %c0_8 = arith.constant 0 : index
    %c0_9 = arith.constant 0 : index
    %16 = vector.load %arg7[%c0_8, %c0_9] : memref<8x1xf32, #tpu.memory_space<vmem>>, vector<8x1xf32>
    tpu.vector_store %arg7[%c0_8, %c0_9], %15 {strides = array<i32>} : memref<8x1xf32, #tpu.memory_space<vmem>>, vector<8x1xf32>,
    %cst_10 = arith.constant 0.000000e+00 : f32
    %17 = vector.broadcast %cst_10 : f32 to vector<8x128xf32>
    %c0_11 = arith.constant 0 : index
    %c0_12 = arith.constant 0 : index
    %18 = vector.load %arg8[%c0_11, %c0_12] : memref<8x128xf32, #tpu.memory_space<vmem>>, vector<8x128xf32>
    tpu.vector_store %arg8[%c0_11, %c0_12], %17 {strides = array<i32>} : memref<8x128xf32, #tpu.memory_space<vmem>>, vector<8x128xf32>,
    %c0_i32 = arith.constant 0 : i32
    %19 = arith.cmpi sge, %arg1, %c0_i32 : i32
    %20 = arith.extui %19 : i1 to i32
    %c0_i32_13 = arith.constant 0 : i32
    %21 = arith.cmpi ne, %20, %c0_i32_13 : i32
    scf.if %21 {
      %44 = vector.broadcast %14 : vector<8x1xf32> to vector<8x8xf32>
      %45 = arith.subf %12, %44 : vector<8x8xf32>
      %46 = math.exp %45 : vector<8x8xf32>
      %c0_30 = arith.constant 0 : index
      %c0_31 = arith.constant 0 : index
      %c0_32 = arith.constant 0 : index
      %47 = vector.load %arg5[%c0_30, %c0_31, %c0_32] : memref<1x8x8xf32, #tpu.memory_space<vmem>>, vector<1x8x8xf32>
      %48 = vector.shape_cast %47 : vector<1x8x8xf32> to vector<8x8xf32>
      %49 = vector.shape_cast %46 : vector<8x8xf32> to vector<1x8x8xf32>
      tpu.vector_store %arg5[%c0_30, %c0_31, %c0_32], %49 {strides = array<i32>} : memref<1x8x8xf32, #tpu.memory_space<vmem>>, vector<1x8x8xf32>,
      %c0_33 = arith.constant 0 : index
      %c0_34 = arith.constant 0 : index
      %50 = vector.load %arg7[%c0_33, %c0_34] : memref<8x1xf32, #tpu.memory_space<vmem>>, vector<8x1xf32>
      %cst_35 = arith.constant dense<0.000000e+00> : vector<8xf32>
      %51 = vector.multi_reduction <add>, %46, %cst_35 [1] : vector<8x8xf32> to vector<8xf32>
      %52 = vector.shape_cast %51 : vector<8xf32> to vector<8x1xf32>
      %53 = arith.addf %50, %52 : vector<8x1xf32>
      %c0_36 = arith.constant 0 : index
      %c0_37 = arith.constant 0 : index
      %54 = vector.load %arg7[%c0_36, %c0_37] : memref<8x1xf32, #tpu.memory_space<vmem>>, vector<8x1xf32>
      tpu.vector_store %arg7[%c0_36, %c0_37], %53 {strides = array<i32>} : memref<8x1xf32, #tpu.memory_space<vmem>>, vector<8x1xf32>,
      %c0_38 = arith.constant 0 : index
      %c0_39 = arith.constant 0 : index
      %55 = vector.load %arg8[%c0_38, %c0_39] : memref<8x128xf32, #tpu.memory_space<vmem>>, vector<8x128xf32>
      %c0_40 = arith.constant 0 : index
      %c0_41 = arith.constant 0 : index
      %c0_42 = arith.constant 0 : index
      %56 = vector.load %arg4[%c0_40, %c0_41, %c0_42] : memref<1x8x128xf32, #tpu.memory_space<vmem>>, vector<1x8x128xf32>
      %57 = vector.shape_cast %56 : vector<1x8x128xf32> to vector<8x128xf32>
      %cst_43 = arith.constant dense<0.000000e+00> : vector<8x128xf32>
      %58 = tpu.matmul %46, %57, %cst_43 {dimension_numbers = #tpu.dot_dimension_numbers<[1], [0], [0], [1], [0, 0, 1, 1], [], []>} : vector<8x8xf32>, vector<8x128xf32>, vector<8x128xf32> -> vector<8x128xf32>
      %59 = arith.addf %55, %58 : vector<8x128xf32>
      %c0_44 = arith.constant 0 : index
      %c0_45 = arith.constant 0 : index
      %60 = vector.load %arg8[%c0_44, %c0_45] : memref<8x128xf32, #tpu.memory_space<vmem>>, vector<8x128xf32>
      tpu.vector_store %arg8[%c0_44, %c0_45], %59 {strides = array<i32>} : memref<8x128xf32, #tpu.memory_space<vmem>>, vector<8x128xf32>,
    } else {
    }
    %c0_i32_14 = arith.constant 0 : i32
    %22 = arith.cmpi slt, %arg1, %c0_i32_14 : i32
    %23 = arith.extui %22 : i1 to i32
    %c0_i32_15 = arith.constant 0 : i32
    %24 = arith.cmpi ne, %23, %c0_i32_15 : i32
    scf.if %24 {
      %cst_30 = arith.constant 0.000000e+00 : f32
      %44 = vector.broadcast %cst_30 : f32 to vector<8x8xf32>
      %c0_31 = arith.constant 0 : index
      %c0_32 = arith.constant 0 : index
      %c0_33 = arith.constant 0 : index
      %45 = vector.load %arg5[%c0_31, %c0_32, %c0_33] : memref<1x8x8xf32, #tpu.memory_space<vmem>>, vector<1x8x8xf32>
      %46 = vector.shape_cast %45 : vector<1x8x8xf32> to vector<8x8xf32>
      %47 = vector.shape_cast %44 : vector<8x8xf32> to vector<1x8x8xf32>
      tpu.vector_store %arg5[%c0_31, %c0_32, %c0_33], %47 {strides = array<i32>} : memref<1x8x8xf32, #tpu.memory_space<vmem>>, vector<1x8x8xf32>,
    } else {
    }
    %c0_16 = arith.constant 0 : index
    %c0_17 = arith.constant 0 : index
    %25 = vector.load %arg7[%c0_16, %c0_17] : memref<8x1xf32, #tpu.memory_space<vmem>>, vector<8x1xf32>
    %26 = tpu.reciprocal %25 {approx = true} : vector<8x1xf32> -> vector<8x1xf32>
    %27 = arith.mulf %25, %26 : vector<8x1xf32>
    %cst_18 = arith.constant 2.000000e+00 : f32
    %28 = vector.broadcast %cst_18 : f32 to vector<8x1xf32>
    %29 = arith.subf %28, %27 : vector<8x1xf32>
    %30 = arith.mulf %26, %29 : vector<8x1xf32>
    %c0_19 = arith.constant 0 : index
    %c0_20 = arith.constant 0 : index
    %c0_21 = arith.constant 0 : index
    %31 = vector.load %arg5[%c0_19, %c0_20, %c0_21] : memref<1x8x8xf32, #tpu.memory_space<vmem>>, vector<1x8x8xf32>
    %32 = vector.shape_cast %31 : vector<1x8x8xf32> to vector<8x8xf32>
    %33 = vector.broadcast %30 : vector<8x1xf32> to vector<8x8xf32>
    %34 = arith.mulf %32, %33 : vector<8x8xf32>
    %c0_22 = arith.constant 0 : index
    %c0_23 = arith.constant 0 : index
    %c0_24 = arith.constant 0 : index
    %35 = vector.load %arg5[%c0_22, %c0_23, %c0_24] : memref<1x8x8xf32, #tpu.memory_space<vmem>>, vector<1x8x8xf32>
    %36 = vector.shape_cast %35 : vector<1x8x8xf32> to vector<8x8xf32>
    %37 = vector.shape_cast %34 : vector<8x8xf32> to vector<1x8x8xf32>
    tpu.vector_store %arg5[%c0_22, %c0_23, %c0_24], %37 {strides = array<i32>} : memref<1x8x8xf32, #tpu.memory_space<vmem>>, vector<1x8x8xf32>,
    %c0_25 = arith.constant 0 : index
    %c0_26 = arith.constant 0 : index
    %38 = vector.load %arg8[%c0_25, %c0_26] : memref<8x128xf32, #tpu.memory_space<vmem>>, vector<8x128xf32>
    %39 = vector.broadcast %30 : vector<8x1xf32> to vector<8x128xf32>
    %40 = arith.mulf %38, %39 : vector<8x128xf32>
    %c0_27 = arith.constant 0 : index
    %c0_28 = arith.constant 0 : index
    %c0_29 = arith.constant 0 : index
    %41 = vector.load %arg6[%c0_27, %c0_28, %c0_29] : memref<1x8x128xf32, #tpu.memory_space<vmem>>, vector<1x8x128xf32>
    %42 = vector.shape_cast %41 : vector<1x8x128xf32> to vector<8x128xf32>
    %43 = vector.shape_cast %40 : vector<8x128xf32> to vector<1x8x128xf32>
    tpu.vector_store %arg6[%c0_27, %c0_28, %c0_29], %43 {strides = array<i32>} : memref<1x8x128xf32, #tpu.memory_space<vmem>>, vector<1x8x128xf32>,
    return
  }
  func.func @transform_0(%arg0: i32, %arg1: i32) -> (i32, i32, i32) {
    %c0_i32 = arith.constant 0 : i32
    %c0_i32_0 = arith.constant 0 : i32
    return %arg0, %arg1, %c0_i32 : i32, i32, i32
  }
  func.func @transform_1(%arg0: i32, %arg1: i32) -> (i32, i32, i32) {
    %c0_i32 = arith.constant 0 : i32
    %c0_i32_0 = arith.constant 0 : i32
    %c0_i32_1 = arith.constant 0 : i32
    return %arg0, %c0_i32, %c0_i32_0 : i32, i32, i32
  }
  func.func @transform_2(%arg0: i32, %arg1: i32) -> (i32, i32, i32) {
    %c0_i32 = arith.constant 0 : i32
    %c0_i32_0 = arith.constant 0 : i32
    %c0_i32_1 = arith.constant 0 : i32
    return %arg0, %c0_i32, %c0_i32_0 : i32, i32, i32
  }
  func.func @transform_3(%arg0: i32, %arg1: i32) -> (i32, i32, i32) {
    %c0_i32 = arith.constant 0 : i32
    %c0_i32_0 = arith.constant 0 : i32
    return %arg0, %arg1, %c0_i32 : i32, i32, i32
  }
  func.func @transform_4(%arg0: i32, %arg1: i32) -> (i32, i32, i32) {
    %c0_i32 = arith.constant 0 : i32
    %c0_i32_0 = arith.constant 0 : i32
    return %arg0, %arg1, %c0_i32 : i32, i32, i32
  }
}

</mosaic_0001>

<bundles_post_ra>
// kernel: tpu_custom_call.1
= control target key start
LH: loop header
LB: loop body
LE: loop exit
PB: predicated region body
PF: predicated region fallthrough
CT: control target
= control target key end

     0   :  { %10 = vsyncpa [#allocation5], 0  ;;  %s1067_s0 = inlined_call_operand.vmem [shape: f32[2,8,32], index: 0, kind: input, shape index: {}]   ;;  %s1068_s1 = inlined_call_operand.vmem [shape: f32[2,32,8], index: 1, kind: input, shape index: {}]   ;;  %s1069_s2 = inlined_call_operand.vmem [shape: f32[2,8,128], index: 2, kind: input, shape index: {}]   ;;  %s1070_s3 = inlined_call_operand.hbm [shape: f32[2,8,8], index: 3, kind: output, shape index: {0}]   ;;  %s1071_s4 = inlined_call_operand.hbm [shape: f32[2,8,128], index: 4, kind: output, shape index: {1}]  }
   0x1   :  { %12 = vsyncpa [#allocation5 + $0x1], 0 }
   0x2   :  { %13 = vsyncpa [#allocation7], 0 }
   0x3   :  { %15 = vsyncpa [#allocation7 + $0x1], 0  ;;  %s899_s15 = smov 0   ;;  %s901_s16 = smov 0  }
   0x4   :  { %s903_s17 = smov 0   ;;  %s905_s18 = smov 0  }
   0x5   :  { %s907_s19 = smov 0   ;;  %s909_s20 = smov 0  }
   0x6 LB: > { %s637_s21 = sadd.s32 4294967295, %s866_s20   ;;  %s638_s22 = sadd.s32 4294967294, %s866_s20   ;;  %s866_s20 = sphi %s909_s20, %s21_s20   ;;  %s862_s19 = sphi %s907_s19, %s1078_s19   ;;  %s858_s18 = sphi %s905_s18, %s1077_s18   ;;  %s854_s17 = sphi %s903_s17, %s1076_s17   ;;  %s850_s16 = sphi %s901_s16, %s1075_s16   ;;  %s846_s15 = sphi %s899_s15, %s1074_s15  }
   0x7   : > { %s33_s23 = sadd.s32 1, %s862_s19  ;;  %s122_s24 = sadd.s32 1, %s854_s17 }
   0x8   : > { %p35_p0 = scmp.ge.s32.totalorder %s33_s23, 2  ;;  %p132_p1 = scmp.ne.s32.totalorder %s854_s17, %s850_s16 }
   0x9   : > { %p133_p2 = scmp.eq.s32.totalorder %s637_s21, 1  ;;  %p138_p3 = scmp.ne.s32.totalorder %s850_s16, %s846_s15 }
   0xa   : > { %s1080_s23 = smov (%p35_p0, %s33_s23), 0  ;;  %p139_p5 = scmp.eq.s32.totalorder %s638_s22, 1 }
   0xb   : > { %p939_p4 = por %p133_p2, %p132_p1  ;;  %s117_s26 = ssub.s32 %s862_s19, %s1080_s23 }
   0xc   : > { %p641_p6 = scmp.ge.s32.totalorder %s866_s20, 1  ;;  %p120_p7 = scmp.eq.s32.totalorder %s117_s26, 0 }
   0xd   : > { %p946_p8 = por %p139_p5, %p138_p3  ;;  %p210_p9 = scmp.lt.s32.totalorder %s866_s20, 3 }
   0xe   : > { %s952_s28 = scalar_select %p120_p7, %s854_s17, %s122_s24  }
   0xf   : > { %p211_p10 = pnand %p641_p6, %p210_p9 }
  0x10   : > { %p252_p11 = scmp.lt.s32.totalorder (!%p211_p10), %s858_s18, 1  ;;  %vm360_vm0 = vcmask (!%p211_p10), 7168   ;;  %v868_v0 = vmov (!%p211_p10), 0.0|0.0   ;;  %vm869_vm1 = vmmov (!%p211_p10), 0   ;;  %v870_v1 = vmov (!%p211_p10), 0.0   ;;  %s972_s21 = sand.u32 (!%p211_p10), 1, %s850_s16  }
  0x11   : > { %214 = sbr.rel (%p211_p10) target bundleno = 746 (0x2ea), region = 32  ;;  %680 = vmatprep.subr.bf16.mxu0 (!%p211_p10), %v868_v0  ;;  %672 = vmatprep.mubr.msk.f32.mxu0 (!%p211_p10), %vm869_vm1, %v870_v1  ;;  %361 = vst.msk [vmem:[#allocation2] sm:$0xff] (!%p211_p10), %vm360_vm0, %v870_v1  ;;  %vm273_vm2 = vcmask (!%p211_p10), 261120   ;;  %v348_v9 = vlaneseq (!%p211_p10)  ;;  %vm356_vm4 = vcmask (!%p211_p10), 64512   ;;  %s642_s22 = sshll.u32 (!%p211_p10), %s972_s21, 3  ;;  %v871_v22 = vmov (!%p211_p10), 0  }
  0x12   : > { %675 = vmatprep.subr.mxu1 (!%p211_p10), %v870_v1  ;;  %677 = vmatprep.mubr.msk.f32.mxu1 (!%p211_p10), %vm869_vm1, %v870_v1  ;;  %s977_s24 = scalar_lea.vmem (!%p211_p10), [#allocation4], %s642_s22  ;;  %s652_s26 = sshll.u32 (!%p211_p10), %s858_s18, 7 }
  0x13   : > { %v349_v10 = vshrl.u32 (!%p211_p10), %v348_v9, 7  ;;  %v353_v11 = vand.u32 (!%p211_p10), 127, %v348_v9  ;;  %750 = vset.pattern.permute.xlu1 (!%p211_p10), %v871_v22  ;;  %751 = vset.pattern.permute.xlu0 (!%p211_p10), %v871_v22  ;;  %s872_s13 = smov (!%p211_p10), [#allocation4]  }
  0x15   : > { %vm354_vm3 = vcmp.ge.s32.totalorder (!%p211_p10), %v349_v10, %v353_v11 }
  0x18   : > { %s957_s29 = scalar_select %p252_p11, %s858_s18, 1  ;;  %v371_v23 = vld [vmem:[#allocation2] sm:$0xff] }
  0x19   : > { %s995_s18 = scalar_lea.hbm %s1071_s4, %s652_s26 }
  0x1a   : > { %s656_s30 = sshll.u32 %s957_s29, 5  ;;  %s644_s8 = sshll.u32 %s957_s29, 3 }
  0x1b   : > { %s263_s7 = scalar_lea.vmem %s1068_s1, %s656_s30  ;;  %s258_s11 = scalar_lea.vmem %s1067_s0, %s644_s8 }
  0x1c   : > { %v269_v2 = vld [vmem:[%s263_s7] sm:$0xff]  ;;  %v270_v3 = vld [vmem:[%s263_s7 + $0x8] sm:$0xff]  ;;  %v271_v4 = vld [vmem:[%s263_s7 + $0x10] sm:$0xff]  ;;  %s267_s14 = scalar_lea.vmem %s1069_s2, %s644_s8  ;;  %s495_s29 = sshll.u32 %s977_s24, 4  ;;  %s990_s29 = int_to_ptr.vmem [resolvable:$true] %s495_s29 }
  0x1d   : > { %v681_v5 = vpack.c.bf16 %v270_v3, %v269_v2  ;;  %v272_v6 = vld [vmem:[%s263_s7 + $0x18] sm:$0xff]  ;;  %v268_v8 = vld [vmem:[%s258_s11] sm:$0xff]  ;;  %s251_s30 = scalar_lea.vmem [#allocation6], %s642_s22  ;;  %s988_s8 = scalar_lea.hbm %s1070_s3, %s652_s26 }
  0x1e   : > { %v684_v7 = vpack.c.bf16 %v272_v6, %v271_v4  ;;  %v378_v16 = vld [vmem:[%s267_s14] sm:$0xff]  ;;  %s509_s5 = sshll.u32 %s251_s30, 4  ;;  %s476_s11 = scalar_lea.sflag [#allocation5], %s972_s21  ;;  %s997_s5 = int_to_ptr.vmem [resolvable:$true] %s509_s5 }
  0x1f   : > { %682 = vmatpush3.bf16.msra.mxu0 %v681_v5  ;;  %676 = vmatpush3.msra.mxu1 %v378_v16  ;;  %s756_s12 = scalar_lea.vmem %s990_s29, 128  ;;  %s760_s14 = sshll.u32 %s872_s13, 4  ;;  %s761_s14 = int_to_ptr.vmem [resolvable:$false] %s760_s14 }
  0x20   : > { %683 = vmatprep.subr.bf16.mxu0 %v868_v0  ;;  %p757_p12 = scmp.ne.s32.totalorder %s990_s29, %s756_s12  ;;  %s762_s22 = scalar_lea.vmem %s761_s14, 256 }
  0x21   : > { %p763_p1 = scmp.lt.s32.totalorder %s990_s29, %s761_s14  ;;  %p764_p2 = scmp.lt.s32.totalorder %s762_s22, %s756_s12 }
  0x22   : > { %p758_p13 = pnand %p757_p12, %p939_p4 }
  0x23   : > { %685 = vmatpush3.bf16.msra.mxu0 %v684_v7  ;;  %p765_p3 = por %p764_p2, %p763_p1 }
  0x24   : > { %p759_p0 = pneg %p758_p13 }
  0x26   : > { %673 = vmatmul.mubr.msk.f32.vlgmr.msra.gmra.mrb[0].mxu0 %vm273_vm2, %v268_v8  ;;  %p766_p5 = pnand %p765_p3, %p759_p0 }
  0xf9   : > { %v343_v12 = vpop.f32.mrb[0].mxu0 }
  0xfa   : > { %v355_v13 = vsel %vm354_vm3, %v343_v12, -inf  ;;  %v674_v14 = vpop.f32.mrb[1].mxu0 }
  0xfb   : > { %v357_v15 = vsel %vm356_vm4, %v355_v13, -inf }
  0xfc   : > { %358 = vmax.xlane.f32.xlu0 %v357_v15 }
 0x189   : > { %v359_v17 = vpop.xlane.xlu0 %358 }
 0x18a   : > { %v367_v18 = vsub.f32 %v355_v13, %v359_v17 }
 0x18c   : > { %v368_v19 = vmul.f32 1.442695, %v367_v18 }
 0x18e   : > { %752 = vpow2.f32 %v368_v19 }
 0x198   : > { %v753_v20 = vpop.eup %752 }
 0x199   : > { %678 = vmatmul.mubr.msk.f32.vlgmr.msra.gmra.mrb[0].mxu1 %vm356_vm4, %v753_v20  ;;  %v372_v21 = vsel %vm356_vm4, %v753_v20, 0.0  ;;  %370 = vst.msk [vmem:[%s977_s24] sm:$0xff] %vm356_vm4, %v753_v20 }
 0x19a   : > { %373 = vadd.xlane.f32.xlu0 %v372_v21 }
 0x1a0   : > { %v464_v34 = vld [vmem:[%s977_s24] sm:$0xff] }
 0x227   : > { %v374_v24 = vpop.xlane.xlu0 %373 }
 0x228   : > { %v375_v25 = vadd.f32 %v374_v24, %v371_v23 }
 0x22a   : > { %376 = vst.msk [vmem:[#allocation2] sm:$0xff] %vm360_vm0, %v375_v25 }
 0x231   : > { %v459_v26 = vld [vmem:[#allocation2] sm:$0xff] }
 0x232   : > { %754 = vrcp.f32 %v459_v26 }
 0x23c   : > { %v755_v27 = vpop.eup %754 }
 0x23d   : > { %v461_v28 = vmul.f32 %v755_v27, %v459_v26 }
 0x23f   : > { %v462_v29 = vsub.f32 2.0, %v461_v28 }
 0x241   : > { %v463_v30 = vmul.f32 %v755_v27, %v462_v29 }
 0x243   : > { %467 = vperm.xlu1 %750, %v463_v30  }
 0x26c   : > { %v448_v31 = vpop.f32.mrb[0].mxu1 }
 0x26d   : > { %v679_v32 = vpop.f32.mrb[1].mxu1 }
 0x2c2   : > { %v468_v33 = vpop.permute.xlu1 %467 }
 0x2c3   : > { %v470_v35 = vmul.f32 %v468_v33, %v464_v34  ;;  %v473_v36 = vmul.f32 %v468_v33, %v448_v31 }
 0x2c5   : > { %474 = vst [vmem:[%s251_s30] sm:$0xff] %v473_v36  ;;  %471 = vst.msk [vmem:[%s977_s24] sm:$0xff] %vm356_vm4, %v470_v35 }
 0x2c6   : > { %769 = shalt.err (!%p766_p5)
}
 0x2c7   : > { %s770_s24 = scalar_lea.hbm %s988_s8, 128  ;;  %s774_s6 = scalar_lea.hbm %s1070_s3, 256 }
 0x2c8   : > { %p771_p6 = scmp.ne.s32.totalorder %s988_s8, %s770_s24  ;;  %p775_p10 = scmp.lt.u32.totalorder %s988_s8, %s1070_s3 }
 0x2c9   : > { %p776_p11 = scmp.lt.u32.totalorder %s774_s6, %s770_s24  ;;  %p778_p13 = scmp.lt.u32.totalorder %s770_s24, %s988_s8 }
 0x2ca   : > { %p772_p7 = pnand %p771_p6, %p939_p4 }
 0x2cb   : > { %p777_p12 = por %p776_p11, %p775_p10 }
 0x2cc   : > { %p773_p9 = pneg %p772_p7 }
 0x2cd   : > { %p779_p0 = por %p778_p13, %p777_p12 }
 0x2cf   : > { %p780_p1 = pnand %p779_p0, %p773_p9 }
 0x2d1   : > { %783 = shalt.err (!%p780_p1)
}
 0x2d2   : > { %686 = dma.vmem_to_hbm [thread:$0]  (%p939_p4), %s990_s29, 128, %s988_s8, %s476_s11  }
 0x2d3   : > { %s481_s10 = scalar_lea.sflag [#allocation7], %s972_s21  ;;  %s784_s12 = scalar_lea.vmem %s997_s5, 128 }
 0x2d4   : > { %p785_p2 = scmp.ne.s32.totalorder %s997_s5, %s784_s12  ;;  %s873_s13 = smov [#allocation6]  }
 0x2d5   : > { %s788_s14 = sshll.u32 %s873_s13, 4  ;;  %s789_s14 = int_to_ptr.vmem [resolvable:$false] %s788_s14 }
 0x2d6   : > { %p786_p3 = pnand %p785_p2, %p939_p4  ;;  %s790_s22 = scalar_lea.vmem %s789_s14, 256 }
 0x2d7   : > { %p791_p6 = scmp.lt.s32.totalorder %s997_s5, %s789_s14  ;;  %p792_p7 = scmp.lt.s32.totalorder %s790_s22, %s784_s12 }
 0x2d8   : > { %p787_p5 = pneg %p786_p3 }
 0x2d9   : > { %p793_p9 = por %p792_p7, %p791_p6 }
 0x2db   : > { %p794_p10 = pnand %p793_p9, %p787_p5 }
 0x2dd   : > { %797 = shalt.err (!%p794_p10)
}
 0x2de   : > { %s798_s21 = scalar_lea.hbm %s995_s18, 128  ;;  %s802_s11 = scalar_lea.hbm %s1071_s4, 256 }
 0x2df   : > { %p799_p11 = scmp.ne.s32.totalorder %s995_s18, %s798_s21  ;;  %p803_p0 = scmp.lt.u32.totalorder %s995_s18, %s1071_s4 }
 0x2e0   : > { %p804_p1 = scmp.lt.u32.totalorder %s802_s11, %s798_s21  ;;  %p806_p3 = scmp.lt.u32.totalorder %s798_s21, %s995_s18 }
 0x2e1   : > { %p800_p12 = pnand %p799_p11, %p939_p4 }
 0x2e2   : > { %p805_p2 = por %p804_p1, %p803_p0 }
 0x2e3   : > { %p801_p13 = pneg %p800_p12 }
 0x2e4   : > { %p807_p5 = por %p806_p3, %p805_p2 }
 0x2e6   : > { %p808_p6 = pnand %p807_p5, %p801_p13 }
 0x2e8   : > { %811 = shalt.err (!%p808_p6)
}
 0x2e9   : > { %687 = dma.vmem_to_hbm [thread:$0]  (%p939_p4), %s997_s5, 128, %s995_s18, %s481_s10  }
 0x2ea PF: > { %p697_p7 = scmp.ge.s32.totalorder %s866_s20, 2  ;;  %s521_s30 = sand.u32 1, %s846_s15  }
 0x2eb   : > { %s522_s6 = scalar_lea.sflag [#allocation5], %s521_s30 }
 0x2ec   : > { %p691_p9 = pnand %p697_p7, %p946_p8 }
 0x2ee   : > { %837 = dma.done.wait (!%p691_p9), %s522_s6, 128  }
 0x2ef   : > { %839 = vsyncadd (!%p691_p9), %s522_s6, 4294967168  ;;  %s531_s7 = scalar_lea.sflag [#allocation7], %s521_s30 }
 0x2f0   : > { %841 = dma.done.wait (!%p691_p9), %s531_s7, 128  }
 0x2f1   : > { %843 = vsyncadd (!%p691_p9), %s531_s7, 4294967168  ;;  %s21_s20 = sadd.s32 1, %s866_s20   ;;  %s1074_s15 = smov %s850_s16 }
 0x2f2   : > { %p18_p10 = scmp.ge.s32.totalorder %s21_s20, 4   ;;  %s1075_s16 = smov %s854_s17 }
 0x2f3   : > { %s1076_s17 = smov %s952_s28  ;;  %s1077_s18 = smov %s862_s19 }
 0x2f4   : > { %s1078_s19 = smov %s1080_s23  ;;  %20 = sbr.rel (!%p18_p10) target bundleno = 6 (0x6), region = 98 }
 0x2fb   :  { %536 = vsyncpa [#allocation5], 1 }
 0x2fc   :  { %538 = vsyncpa [#allocation5 + $0x1], 1 }
 0x2fd   :  { %539 = vsyncpa [#allocation7], 1 }
 0x2fe   :  { %541 = vsyncpa [#allocation7 + $0x1], 1 }

</bundles_post_ra>
